<compile_context>
chip_gen: v6e
topology: v6e:2x2x1
jax: 0.10.0
libtpu: 0.0.40
codegen_flags: <defaults>
</compile_context>

<pallas_src>
import functools

import jax
import jax.numpy as jnp
from jax.experimental import pallas as pl
from jax.experimental.pallas import tpu as pltpu

LANE = 128
SUBLANE = 8


def _round_up(x, m):
    return ((x + m - 1) // m) * m


def _vmem_capacity_bytes():
    """Physical VMEM per TensorCore; used to branch v7x (64 MiB) vs v5e/v6e."""
    try:
        return int(pltpu.get_tpu_info().vmem_capacity_bytes)
    except Exception:
        return 64 << 20  # conservative (v7x-sized) fallback


def _choose_tile_rows(rows, d_use, n_streams, itemsize, n_f32_temps, vmem_cap):
    """Pick a sublane-aligned row tile for the HBM-bound regime.

    Sizes tiles by *bytes streamed per grid step* (inputs + output), then
    clamps so the double-buffered DMA working set plus f32 staging fits the
    scoped-VMEM cap of the current generation.  Returns (tile_rows, vmem_cap
    to use as the vmem_limit ceiling).
    """
    small_vmem = vmem_cap <= (96 << 20)               # v7x: 64 MiB per TC
    per_step_target = (6 << 20) if small_vmem else (14 << 20)
    total_cap = (44 << 20) if small_vmem else (64 << 20)

    per_row_dma = n_streams * d_use * itemsize        # streamed bytes / row / step
    per_row_total = 2 * per_row_dma + n_f32_temps * d_use * 4

    t = per_step_target // per_row_dma
    t = min(t, max(SUBLANE, (total_cap - (4 << 20)) // per_row_total))
    t = max(SUBLANE, (t // SUBLANE) * SUBLANE)

    rows_pad8 = _round_up(rows, SUBLANE)
    # Core-aware minimum step count: prefer >= 4 grid steps (>= 2 per v7x TC)
    # when there are enough rows, so each core keeps DMA/compute overlap.
    if rows_pad8 >= 4 * SUBLANE:
        t = min(t, _round_up(pl.cdiv(rows_pad8, 4), SUBLANE))
    elif rows_pad8 >= 2 * SUBLANE:
        t = min(t, _round_up(pl.cdiv(rows_pad8, 2), SUBLANE))
    t = max(SUBLANE, min(t, rows_pad8))
    return t, total_cap


def _rmsnorm_kernel(x_ref, w_ref, o_ref, *, eps, d_true):
    x = x_ref[...].astype(jnp.float32)
    w = w_ref[...].astype(jnp.float32)                # [1, d], broadcasts
    # Any zero-padded lanes contribute nothing; divide by the true d.
    ms = jnp.sum(x * x, axis=-1, keepdims=True) * (1.0 / d_true)
    inv = jax.lax.rsqrt(ms + eps)
    o_ref[...] = (x * inv * w).astype(o_ref.dtype)


def _gated_rmsnorm_kernel(x_ref, z_ref, w_ref, o_ref, *, eps, d_true):
    x = x_ref[...].astype(jnp.float32)
    z = z_ref[...].astype(jnp.float32)
    w = w_ref[...].astype(jnp.float32)
    x = x * (z * jax.nn.sigmoid(z))                   # x * silu(z)
    ms = jnp.sum(x * x, axis=-1, keepdims=True) * (1.0 / d_true)
    inv = jax.lax.rsqrt(ms + eps)
    o_ref[...] = (x * inv * w).astype(o_ref.dtype)


def rmsnorm(x, weight, z=None, eps=1e-5):
    """Pallas-backed gated RMSNorm, matching the PyTorch module semantics."""
    orig_shape = x.shape
    d = orig_shape[-1]
    rows = 1
    for s in orig_shape[:-1]:
        rows *= s
    if rows == 0 or d == 0:
        return x

    x2d = x.reshape(rows, d)
    z2d = z.reshape(rows, d) if z is not None else None
    w2d = weight.reshape(1, d)

    n_streams = 3 if z is not None else 2             # x, [z], out (all DMA'd)
    n_f32 = 6 if z is not None else 3                 # live f32 temporaries
    itemsize = jnp.dtype(x.dtype).itemsize

    # Lane handling: stream the true d (no extra HBM pad/slice pass) unless d
    # is both small and ragged, where masked tail stores would dominate.
    if d % LANE == 0 or d >= 256:
        d_use = d
        pad_d = False
    else:
        d_use = _round_up(d, LANE)
        pad_d = True
        x2d = jnp.pad(x2d, ((0, 0), (0, d_use - d)))
        if z2d is not None:
            z2d = jnp.pad(z2d, ((0, 0), (0, d_use - d)))
        w2d = jnp.pad(w2d, ((0, 0), (0, d_use - d)))

    vmem_cap = _vmem_capacity_bytes()
    tile_rows, total_cap = _choose_tile_rows(
        rows, d_use, n_streams, itemsize, n_f32, vmem_cap)

    # Ragged last block: OOB rows read garbage but their stores are masked by
    # Pallas; safe because normalization is strictly per-row (see header note).
    grid = (pl.cdiv(rows, tile_rows),)
    row_spec = pl.BlockSpec((tile_rows, d_use), lambda i: (i, 0))
    w_spec = pl.BlockSpec((1, d_use), lambda i: (0, 0))

    if z is None:
        kernel = functools.partial(_rmsnorm_kernel, eps=eps, d_true=float(d))
        in_specs = [row_spec, w_spec]
        args = (x2d, w2d)
    else:
        kernel = functools.partial(_gated_rmsnorm_kernel, eps=eps, d_true=float(d))
        in_specs = [row_spec, row_spec, w_spec]
        args = (x2d, z2d, w2d)

    # Scoped VMEM: double-buffered DMA tiles + f32 staging (scaled with the
    # number of live f32 temporaries of the chosen path) + headroom, clamped
    # below the per-generation cap.
    dma_bytes = 2 * n_streams * tile_rows * d_use * itemsize
    staging_bytes = n_f32 * tile_rows * d_use * 4
    vmem_limit = int(min(total_cap,
                         max(16 << 20, dma_bytes + staging_bytes + (4 << 20))))

    out = pl.pallas_call(
        kernel,
        out_shape=jax.ShapeDtypeStruct((rows, d_use), x.dtype),
        grid_spec=pltpu.PrefetchScalarGridSpec(
            num_scalar_prefetch=0,
            grid=grid,
            in_specs=in_specs,
            out_specs=row_spec,
        ),
        compiler_params=pltpu.CompilerParams(
            dimension_semantics=("parallel",),
            vmem_limit_bytes=vmem_limit,
        ),
    )(*args)

    if pad_d:
        out = out[:, :d]
    return out.reshape(orig_shape)


def _rmsnorm_ref(x, weight, z=None, eps=1e-5):
    x = x.astype(jnp.float32)
    if z is not None:
        z = z.astype(jnp.float32)
        x = x * (z * jax.nn.sigmoid(z))
    ms = jnp.mean(x * x, axis=-1, keepdims=True)
    return x * jax.lax.rsqrt(ms + eps) * weight.astype(jnp.float32)


if __name__ == "__main__":
    key = jax.random.PRNGKey(0)
    k1, k2, k3, k4, k5, k6 = jax.random.split(key, 6)

    # Small shape consistent with the module: batch=2, seq=8, hidden=32.
    batch, seq, d = 2, 8, 32
    x = jax.random.normal(k1, (batch, seq, d), dtype=jnp.float32)
    z = jax.random.normal(k2, (batch, seq, d), dtype=jnp.float32)
    weight = jnp.ones((d,), dtype=jnp.float32)  # matches nn.Parameter(torch.ones(d))

    # Ungated path (z=None)
    out_plain = jax.block_until_ready(rmsnorm(x, weight, z=None))
    ref_plain = _rmsnorm_ref(x, weight, z=None)
    assert jnp.allclose(out_plain, ref_plain, atol=1e-5, rtol=1e-5)

    # Gated path (z provided)
    out_gated = jax.block_until_ready(rmsnorm(x, weight, z=z))
    ref_gated = _rmsnorm_ref(x, weight, z=z)
    assert jnp.allclose(out_gated, ref_gated, atol=1e-5, rtol=1e-5)

    # Ragged rows + small ragged d: exercises the masked last row-block and
    # the lane-padding path for tiny d.
    b2, s2, d2 = 3, 5, 48
    x2 = jax.random.normal(k3, (b2, s2, d2), dtype=jnp.float32)
    z2 = jax.random.normal(k4, (b2, s2, d2), dtype=jnp.float32)
    w2 = jax.random.normal(k5, (d2,), dtype=jnp.float32) * 0.1 + 1.0
    out2 = jax.block_until_ready(rmsnorm(x2, w2, z=z2))
    ref2 = _rmsnorm_ref(x2, w2, z=z2)
    assert jnp.allclose(out2, ref2, atol=1e-5, rtol=1e-5)

    # Ragged d >= 256: exercises the true-d (no lane-pad) block with a masked
    # lane tail, plus a masked last row-block.
    b3, s3, d3 = 2, 5, 272
    x3 = jax.random.normal(k6, (b3, s3, d3), dtype=jnp.float32)
    w3 = jnp.ones((d3,), dtype=jnp.float32)
    out3 = jax.block_until_ready(rmsnorm(x3, w3, z=None))
    ref3 = _rmsnorm_ref(x3, w3, z=None)
    assert jnp.allclose(out3, ref3, atol=1e-5, rtol=1e-5)

    print("KERNEL_OK")
</pallas_src>

<mosaic_0001>
module attributes {stable_mosaic.version = 11 : i64} {
  func.func @_rmsnorm_kernel(%arg0: i32, %arg1: memref<8x128xf32, #tpu.memory_space<vmem>>, %arg2: memref<1x128xf32, #tpu.memory_space<vmem>>, %arg3: memref<8x128xf32, #tpu.memory_space<vmem>>) attributes {dimension_semantics = [#tpu.dimension_semantics<parallel>], iteration_bounds = array<i64: 2>, scalar_prefetch = 0 : i64, scratch_operands = 0 : i64, tpu.core_type = #tpu.core_type<tc>, window_params = [{transform_indices = @transform_0, window_bounds = array<i64: 8, 128>}, {pipeline_mode = #tpu.pipeline_mode<synchronous>, transform_indices = @transform_1, window_bounds = array<i64: 1, 128>}, {transform_indices = @transform_2, window_bounds = array<i64: 8, 128>}]} {
    %c0 = arith.constant 0 : index
    %c0_0 = arith.constant 0 : index
    %0 = vector.load %arg1[%c0, %c0_0] : memref<8x128xf32, #tpu.memory_space<vmem>>, vector<8x128xf32>
    %c0_1 = arith.constant 0 : index
    %c0_2 = arith.constant 0 : index
    %1 = vector.load %arg2[%c0_1, %c0_2] : memref<1x128xf32, #tpu.memory_space<vmem>>, vector<1x128xf32>
    %2 = arith.mulf %0, %0 : vector<8x128xf32>
    %cst = arith.constant dense<0.000000e+00> : vector<8xf32>
    %3 = vector.multi_reduction <add>, %2, %cst [1] : vector<8x128xf32> to vector<8xf32>
    %4 = vector.shape_cast %3 : vector<8xf32> to vector<8x1xf32>
    %cst_3 = arith.constant 3.125000e-02 : f32
    %5 = vector.broadcast %cst_3 : f32 to vector<8x1xf32>
    %6 = arith.mulf %4, %5 : vector<8x1xf32>
    %cst_4 = arith.constant 9.99999974E-6 : f32
    %7 = vector.broadcast %cst_4 : f32 to vector<8x1xf32>
    %8 = arith.addf %6, %7 : vector<8x1xf32>
    %9 = math.rsqrt %8 : vector<8x1xf32>
    %10 = vector.broadcast %9 : vector<8x1xf32> to vector<8x128xf32>
    %11 = arith.mulf %0, %10 : vector<8x128xf32>
    %12 = vector.broadcast %1 : vector<1x128xf32> to vector<8x128xf32>
    %13 = arith.mulf %11, %12 : vector<8x128xf32>
    %c0_5 = arith.constant 0 : index
    %c0_6 = arith.constant 0 : index
    %14 = vector.load %arg3[%c0_5, %c0_6] : memref<8x128xf32, #tpu.memory_space<vmem>>, vector<8x128xf32>
    tpu.vector_store %arg3[%c0_5, %c0_6], %13 {strides = array<i32>} : memref<8x128xf32, #tpu.memory_space<vmem>>, vector<8x128xf32>,
    return
  }
  func.func @transform_0(%arg0: i32) -> (i32, i32) {
    %c0_i32 = arith.constant 0 : i32
    %c0_i32_0 = arith.constant 0 : i32
    return %arg0, %c0_i32 : i32, i32
  }
  func.func @transform_1(%arg0: i32) -> (i32, i32) {
    %c0_i32 = arith.constant 0 : i32
    %c0_i32_0 = arith.constant 0 : i32
    %c0_i32_1 = arith.constant 0 : i32
    return %c0_i32, %c0_i32_0 : i32, i32
  }
  func.func @transform_2(%arg0: i32) -> (i32, i32) {
    %c0_i32 = arith.constant 0 : i32
    %c0_i32_0 = arith.constant 0 : i32
    return %arg0, %c0_i32 : i32, i32
  }
}

</mosaic_0001>

<bundles_post_ra>
// kernel: tpu_custom_call.1
= control target key start
LH: loop header
LB: loop body
LE: loop exit
PB: predicated region body
PF: predicated region fallthrough
CT: control target
= control target key end

     0   :  { %7 = vsyncpa [#allocation3], 0  ;;  %s576_s0 = inlined_call_operand.hbm [shape: f32[16,128], index: 0, kind: input, shape index: {}]   ;;  %s577_s1 = inlined_call_operand.vmem [shape: f32[1,128], index: 1, kind: input, shape index: {}]   ;;  %s578_s2 = inlined_call_operand.hbm [shape: f32[16,128], index: 2, kind: output, shape index: {}]  }
   0x1   :  { %9 = vsyncpa [#allocation3 + $0x1], 0 }
   0x2   :  { %10 = vsyncpa [#allocation4], 0 }
   0x3   :  { %12 = vsyncpa [#allocation4 + $0x1], 0  ;;  %s432_s9 = smov 0   ;;  %s434_s10 = smov 0  }
   0x4   :  { %s436_s11 = smov 0   ;;  %s438_s12 = smov 0  }
   0x5 LB: > { %s453_s13 = sadd.s32 4294967295, %s413_s12   ;;  %s260_s14 = sadd.s32 4294967294, %s413_s12   ;;  %s413_s12 = sphi %s438_s12, %s595_s12   ;;  %s409_s11 = sphi %s436_s11, %s594_s11   ;;  %s405_s10 = sphi %s434_s10, %s593_s10   ;;  %s401_s9 = sphi %s432_s9, %s592_s9  }
   0x6   : > { %s457_s15 = sadd.s32 1, %s413_s12   ;;  %s25_s16 = sadd.s32 1, %s409_s11 }
   0x7   : > { %s22_s17 = ssub.s32 %s413_s12, %s457_s15  ;;  %p32_p0 = scmp.ne.s32.totalorder %s409_s11, %s405_s10 }
   0x8   : > { %p23_p1 = scmp.eq.s32.totalorder %s22_s17, 0  ;;  %p33_p2 = scmp.eq.s32.totalorder %s413_s12, 0 }
   0x9   : > { %p38_p3 = scmp.ne.s32.totalorder %s405_s10, %s401_s9  ;;  %p39_p4 = scmp.eq.s32.totalorder %s453_s13, 0 }
   0xa   : > { %s469_s18 = scalar_select %p23_p1, %s409_s11, %s25_s16  }
   0xb   : > { %p471_p5 = por %p33_p2, %p32_p0  ;;  %p475_p6 = por %p39_p4, %p38_p3 }
   0xc   : > { %p83_p7 = scmp.eq.s32.totalorder %s453_s13, 1  ;;  %p89_p8 = scmp.eq.s32.totalorder %s260_s14, 1 }
   0xd   : > { %s582_s20 = scalar_select %p475_p6, 1, 0 }
   0xe   : > { %p285_p10 = scmp.lt.s32.totalorder %s413_s12, 2  ;;  %p482_p11 = por %p83_p7, %p32_p0 }
   0xf   : > { %p486_p12 = por %p89_p8, %p38_p3  ;;  %s112_s23 = sand.u32 1, %s409_s11  }
  0x10   : > { %s583_s21 = scalar_select %p482_p11, 1, 0 }
  0x11   : > { %s584_s22 = scalar_select %p486_p12, 1, 0 }
  0x12   : > { %s264_s24 = sshll.u32 %s413_s12, 7  ;;  %s263_s25 = sshll.u32 %s112_s23, 3 }
  0x13   : > { %s495_s28 = scalar_lea.hbm %s576_s0, %s264_s24  ;;  %s116_s29 = scalar_lea.vmem [#allocation2], %s263_s25 }
  0x14   : > { %s123_s30 = sshll.u32 %s116_s29, 4  ;;  %p499_p13 = pnand %p285_p10, %p471_p5  ;;  %s503_s30 = int_to_ptr.vmem [resolvable:$true] %s123_s30 }
  0x15   : > { %s113_s4 = scalar_lea.sflag [#allocation3], %s112_s23  ;;  %s321_s5 = scalar_lea.hbm %s495_s28, 128 }
  0x16   : > { %p322_p2 = scmp.ne.s32.totalorder %s495_s28, %s321_s5  ;;  %p323_p3 = pneg %p499_p13 }
  0x17   : > { %s326_s8 = scalar_lea.hbm %s576_s0, 256  ;;  %p327_p5 = scmp.lt.s32.totalorder %s495_s28, %s576_s0 }
  0x18   : > { %p324_p4 = pnand %p323_p3, %p322_p2  ;;  %p328_p8 = scmp.lt.s32.totalorder %s326_s8, %s321_s5 }
  0x1a   : > { %p325_p7 = pneg %p324_p4  ;;  %p329_p10 = por %p328_p8, %p327_p5 }
  0x1c   : > { %p330_p9 = pnand %p329_p10, %p325_p7 }
  0x1e   : > { %333 = shalt.err (!%p330_p9)
}
  0x1f   : > { %s334_s17 = scalar_lea.vmem %s503_s30, 128  ;;  %s415_s19 = smov [#allocation2]  }
  0x20   : > { %p335_p0 = scmp.ne.s32.totalorder %s503_s30, %s334_s17  ;;  %s339_s23 = sshll.u32 %s415_s19, 4  ;;  %s340_s23 = int_to_ptr.vmem [resolvable:$false] %s339_s23 }
  0x21   : > { %s341_s24 = scalar_lea.vmem %s340_s23, 256  ;;  %p342_p4 = scmp.lt.s32.totalorder %s503_s30, %s340_s23 }
  0x22   : > { %p337_p1 = pnand %p335_p0, %p323_p3  ;;  %p343_p12 = scmp.lt.s32.totalorder %s341_s24, %s334_s17 }
  0x24   : > { %p338_p2 = pneg %p337_p1  ;;  %p344_p11 = por %p343_p12, %p342_p4 }
  0x26   : > { %p345_p6 = pnand %p344_p11, %p338_p2 }
  0x28   : > { %348 = shalt.err (!%p345_p6)
}
  0x29   : > { %280 = dma.hbm_to_vmem [thread:$0]  (!%p499_p13), %s495_s28, 128, %s503_s30, %s113_s4  }
  0x2a   : > { %p586_p9 = scmp.lt.s32.totalorder %s413_s12, 3  ;;  %p587_p7 = scmp.ge.s32.totalorder %s413_s12, 1 }
  0x2c   : > { %p129_p0 = pnand %p587_p7, %p586_p9 }
  0x2d   : > { %s530_s25 = sand.u32 (!%p129_p0), 1, %s405_s10   ;;  %p588_p6 = scmp.ne.s32.totalorder (!%p129_p0), %s582_s20, 0 }
  0x2e   : > { %132 = sbr.rel (%p129_p0) target bundleno = 228 (0xe4), region = 28  ;;  %s266_s26 = sshll.u32 (!%p129_p0), %s530_s25, 3 }
  0x2f   : > { %s135_s27 = scalar_lea.sflag (!%p129_p0), [#allocation3], %s530_s25  ;;  %s138_s29 = scalar_lea.vmem (!%p129_p0), [#allocation2], %s266_s26 }
  0x33   : > { %392 = dma.done.wait (%p588_p6), %s135_s27, 128  }
  0x34   : > { %394 = vsyncadd (%p588_p6), %s135_s27, 4294967168  ;;  %v159_v0 = vld [vmem:[%s138_s29] sm:$0xff]  ;;  %s270_s3 = sshll.u32 %s453_s13, 7  ;;  %s158_s4 = scalar_lea.vmem [#allocation5], %s266_s26 }
  0x35   : > { %v161_v1 = vmul.f32 %v159_v0, %v159_v0  ;;  %v268_v6 = vld [vmem:[%s577_s1] ss:$0 sm:$0xff]  ;;  %s190_s5 = sshll.u32 %s158_s4, 4  ;;  %s188_s7 = scalar_lea.hbm %s578_s2, %s270_s3  ;;  %s191_s5 = int_to_ptr.vmem [resolvable:$true] %s190_s5 }
  0x36   : > { %s177_s8 = scalar_lea.sflag [#allocation4], %s530_s25  ;;  %s349_s14 = scalar_lea.vmem %s191_s5, 128 }
  0x37   : > { %162 = vadd.xlane.f32.xlu0 %v161_v1  ;;  %p350_p11 = scmp.ne.s32.totalorder %s191_s5, %s349_s14  ;;  %p589_p12 = scmp.ne.s32.totalorder %s583_s21, 0 }
  0x38   : > { %s416_s16 = smov [#allocation5]  }
  0x39   : > { %p351_p13 = pnand %p350_p11, %p589_p12  ;;  %s353_s17 = sshll.u32 %s416_s16, 4  ;;  %s354_s17 = int_to_ptr.vmem [resolvable:$false] %s353_s17 }
  0x3a   : > { %s355_s13 = scalar_lea.vmem %s354_s17, 256  ;;  %p356_p3 = scmp.lt.s32.totalorder %s191_s5, %s354_s17 }
  0x3b   : > { %p352_p1 = pneg %p351_p13  ;;  %p357_p5 = scmp.lt.s32.totalorder %s355_s13, %s349_s14 }
  0x3d   : > { %p358_p8 = por %p357_p5, %p356_p3 }
  0x3f   : > { %p359_p10 = pnand %p358_p8, %p352_p1 }
  0xc0   : > { %v163_v2 = vpop.xlane.xlu0 %162 }
  0xc1   : > { %v164_v3 = vmul.f32 0.03125, %v163_v2 }
  0xc3   : > { %v165_v4 = vadd.f32 1e-05, %v164_v3 }
  0xc5   : > { %319 = vrsqrt.f32 %v165_v4 }
  0xd2   : > { %v320_v5 = vpop.eup %319 }
  0xd3   : > { %v167_v7 = vmul.f32 %v320_v5, %v159_v0 }
  0xd5   : > { %v174_v8 = vmul.f32 %v268_v6, %v167_v7 }
  0xd7   : > { %175 = vst [vmem:[%s158_s4] sm:$0xff] %v174_v8 }
  0xd8   : > { %362 = shalt.err (!%p359_p10)
}
  0xd9   : > { %s363_s19 = scalar_lea.hbm %s188_s7, 128  ;;  %s367_s25 = scalar_lea.hbm %s578_s2, 256 }
  0xda   : > { %p364_p2 = scmp.ne.s32.totalorder %s188_s7, %s363_s19  ;;  %p368_p7 = scmp.lt.s32.totalorder %s188_s7, %s578_s2 }
  0xdb   : > { %p369_p0 = scmp.lt.s32.totalorder %s367_s25, %s363_s19 }
  0xdc   : > { %p365_p4 = pnand %p364_p2, %p589_p12 }
  0xdd   : > { %p370_p6 = por %p369_p0, %p368_p7 }
  0xde   : > { %p366_p9 = pneg %p365_p4 }
  0xe0   : > { %p371_p11 = pnand %p370_p6, %p366_p9 }
  0xe2   : > { %374 = shalt.err (!%p371_p11)
}
  0xe3   : > { %275 = dma.vmem_to_hbm [thread:$0]  (%p589_p12), %s191_s5, 128, %s188_s7, %s177_s8  }
  0xe4 PF: > { %s202_s29 = sand.u32 1, %s401_s9   ;;  %p590_p13 = scmp.ne.s32.totalorder %s584_s22, 0 }
  0xe5   : > { %p591_p1 = scmp.ge.s32.totalorder %s413_s12, 2  ;;  %s203_s28 = scalar_lea.sflag [#allocation4], %s202_s29 }
  0xe7   : > { %p282_p3 = pnand %p591_p1, %p590_p13 }
  0xe9   : > { %p283_p5 = pneg %p282_p3 }
  0xeb   : > { %396 = dma.done.wait (%p283_p5), %s203_s28, 128  }
  0xec   : > { %398 = vsyncadd (%p283_p5), %s203_s28, 4294967168  ;;  %p15_p8 = scmp.ge.s32.totalorder %s457_s15, 4   ;;  %s592_s9 = smov %s405_s10 }
  0xed   : > { %s593_s10 = smov %s409_s11  ;;  %s594_s11 = smov %s469_s18 }
  0xee   : > { %s595_s12 = smov %s457_s15  ;;  %17 = sbr.rel (!%p15_p8) target bundleno = 5 (0x5), region = 73 }
  0xf3   :  { %208 = vsyncpa [#allocation3], 1 }
  0xf4   :  { %210 = vsyncpa [#allocation3 + $0x1], 1 }
  0xf5   :  { %211 = vsyncpa [#allocation4], 1 }
  0xf6   :  { %213 = vsyncpa [#allocation4 + $0x1], 1 }

</bundles_post_ra>
